<compile_context>
chip_gen: v7x
topology: tpu7x:2x2x1
jax: 0.10.0
libtpu: 0.0.40
codegen_flags: <defaults>
</compile_context>

<pallas_src>
import math
import numpy as np
import jax
import jax.numpy as jnp
from jax.experimental import pallas as pl
from jax.experimental.pallas import tpu as pltpu

_A = -0.75  # PyTorch / Keys bicubic coefficient


def _cubic1(t, A=_A):
    return ((A + 2.0) * t - (A + 3.0)) * t * t + 1.0


def _cubic2(t, A=_A):
    return ((A * t - 5.0 * A) * t + 8.0 * A) * t - 4.0 * A


def bicubic_weight_matrix(out_size, in_size):
    """Dense (out_size, in_size) bicubic interpolation matrix (align_corners=False,
    edge-clamped), matching torch.nn.functional.interpolate(mode='bicubic')."""
    W = np.zeros((out_size, in_size), dtype=np.float64)
    scale = in_size / out_size
    for i in range(out_size):
        src = (i + 0.5) * scale - 0.5
        base = math.floor(src)
        t = src - base
        coeffs = (_cubic2(t + 1.0), _cubic1(t), _cubic1(1.0 - t), _cubic2(2.0 - t))
        for k in range(4):
            idx = min(max(base - 1 + k, 0), in_size - 1)
            W[i, idx] += coeffs[k]
    return W.astype(np.float32)


def _resized_hw(h, w, size):
    """torchvision Resize with a single int: smaller edge -> size.
    # TODO(synk): verify int() truncation vs. the exact torchvision rounding
    # rule of the target version (affects new long edge -> crop offset by 1)."""
    if h <= w:
        return size, int(size * w / h)
    return int(size * h / w), size


def _transform_kernel(x_ref, wh_ref, wwT_ref, scale_ref, offset_ref, o_ref):
    # x_ref      : (C, H, W)  uint8   -- one full image (all channels)
    # wh_ref     : (S, H)     f32     -- row (H) interpolation + crop
    # wwT_ref    : (W, S)     f32     -- col (W) interpolation + crop, transposed
    # scale_ref  : (1, C*S)   f32     -- 1/(255*std[c]) repeated S times per channel
    # offset_ref : (1, C*S)   f32     -- -mean[c]/std[c] repeated S times per channel
    # o_ref      : (S, C*S)   f32     -- lane-dense output slab
    C, H, W = x_ref.shape
    S = wh_ref.shape[0]

    # In-kernel uint8 -> f32 cast (zero-extend to i32, then to f32).
    xf = x_ref[...].astype(jnp.int32).astype(jnp.float32)          # (C, H, W)

    # Fused W-contraction for all channels at once: big MXU matmul, M = C*H.
    t1 = jnp.dot(xf.reshape(C * H, W), wwT_ref[...],
                 preferred_element_type=jnp.float32)                # (C*H, S)

    # Per-channel H-contraction (C small static matmuls), concatenated along
    # the lane axis so the store is one unmasked (S, C*S) slab.
    wh = wh_ref[...]                                                # (S, H)
    planes = [
        jnp.dot(wh, t1[c * H:(c + 1) * H, :],
                preferred_element_type=jnp.float32)                 # (S, S)
        for c in range(C)
    ]
    out = jnp.concatenate(planes, axis=1)                           # (S, C*S)

    # Fused ConvertImageDtype(/255) + Normalize((x - mean)/std).
    o_ref[...] = out * scale_ref[...] + offset_ref[...]


def transform_forward(x_uint8, image_size, mean, std):
    """x_uint8: (N, C, H, W) uint8 image batch -> (N, C, image_size, image_size) f32."""
    n, c, h, w = x_uint8.shape
    S = image_size
    new_h, new_w = _resized_hw(h, w, S)
    assert new_h >= S and new_w >= S

    # Resize matrices with CenterCrop folded in by slicing output rows.
    top = int(round((new_h - S) / 2.0))
    left = int(round((new_w - S) / 2.0))
    Wh = jnp.asarray(bicubic_weight_matrix(new_h, h)[top:top + S])          # (S, H)
    WwT = jnp.asarray(bicubic_weight_matrix(new_w, w)[left:left + S].T)     # (W, S)

    mean_a = np.asarray(mean, dtype=np.float32)
    std_a = np.asarray(std, dtype=np.float32)
    scale_c = (1.0 / (255.0 * std_a)).astype(np.float32)   # ConvertImageDtype folded in
    offset_c = (-mean_a / std_a).astype(np.float32)
    # Lane-expanded per-channel affine: lane index = c*S + col.
    scale_lane = jnp.asarray(np.repeat(scale_c, S).reshape(1, c * S))
    offset_lane = jnp.asarray(np.repeat(offset_c, S).reshape(1, c * S))

    out_lane = pl.pallas_call(
        _transform_kernel,
        out_shape=jax.ShapeDtypeStruct((n, S, c * S), jnp.float32),
        grid_spec=pltpu.PrefetchScalarGridSpec(
            num_scalar_prefetch=0,
            grid=(n,),
            in_specs=[
                # uint8 image, one full (C, H, W) block per grid step.
                pl.BlockSpec((None, c, h, w), lambda i: (i, 0, 0, 0)),
                # Constant-index weight / affine blocks: DMA'd once, stay VMEM-resident.
                pl.BlockSpec((S, h), lambda i: (0, 0)),
                pl.BlockSpec((w, S), lambda i: (0, 0)),
                pl.BlockSpec((1, c * S), lambda i: (0, 0)),
                pl.BlockSpec((1, c * S), lambda i: (0, 0)),
            ],
            out_specs=pl.BlockSpec((None, S, c * S), lambda i: (i, 0, 0)),
        ),
        compiler_params=pltpu.CompilerParams(
            # batch axis parallel -> shards across v7x's 2 TensorCores; no-op on v5e/v6e.
            dimension_semantics=("parallel",)),
    )(x_uint8, Wh, WwT, scale_lane, offset_lane)

    # Layout plumbing only: (N, S, C*S) lane-dense slab -> NCHW.
    out = out_lane.reshape(n, S, c, S).transpose(0, 2, 1, 3)
    return out


if __name__ == "__main__":
    key = jax.random.PRNGKey(0)
    N, C, H, W = 2, 3, 24, 32
    IMAGE_SIZE = 16
    MEAN = (0.48145466, 0.4578275, 0.40821073)
    STD = (0.26862954, 0.26130258, 0.27577711)

    x = jax.random.randint(key, (N, C, H, W), 0, 256, dtype=jnp.int32).astype(jnp.uint8)

    out = transform_forward(x, IMAGE_SIZE, MEAN, STD)
    out = jax.block_until_ready(out)
    assert out.shape == (N, C, IMAGE_SIZE, IMAGE_SIZE)
    assert out.dtype == jnp.float32

    # Pure-JAX reference using the same interpolation matrices (sanity check).
    new_h, new_w = _resized_hw(H, W, IMAGE_SIZE)
    top = int(round((new_h - IMAGE_SIZE) / 2.0))
    left = int(round((new_w - IMAGE_SIZE) / 2.0))
    Wh_ref = jnp.asarray(bicubic_weight_matrix(new_h, H)[top:top + IMAGE_SIZE])
    Ww_ref = jnp.asarray(bicubic_weight_matrix(new_w, W)[left:left + IMAGE_SIZE])
    resized = jnp.einsum('oh,nchw,pw->ncop', Wh_ref, x.astype(jnp.float32), Ww_ref)
    mean_a = jnp.asarray(MEAN, dtype=jnp.float32).reshape(1, C, 1, 1)
    std_a = jnp.asarray(STD, dtype=jnp.float32).reshape(1, C, 1, 1)
    ref = (resized / 255.0 - mean_a) / std_a
    np.testing.assert_allclose(np.asarray(out), np.asarray(ref), rtol=1e-5, atol=3e-5)

    print("KERNEL_OK")
</pallas_src>

<mosaic_0001>
module attributes {stable_mosaic.version = 11 : i64} {
  func.func @_transform_kernel(%arg0: i32, %arg1: memref<1x3x24x32xi8, #tpu.memory_space<vmem>>, %arg2: memref<16x24xf32, #tpu.memory_space<vmem>>, %arg3: memref<32x16xf32, #tpu.memory_space<vmem>>, %arg4: memref<1x48xf32, #tpu.memory_space<vmem>>, %arg5: memref<1x48xf32, #tpu.memory_space<vmem>>, %arg6: memref<1x16x48xf32, #tpu.memory_space<vmem>>) attributes {dimension_semantics = [#tpu.dimension_semantics<parallel>], iteration_bounds = array<i64: 2>, scalar_prefetch = 0 : i64, scratch_operands = 0 : i64, tpu.core_type = #tpu.core_type<tc>, window_params = [{transform_indices = @transform_0, window_bounds = array<i64: 1, 3, 24, 32>}, {pipeline_mode = #tpu.pipeline_mode<synchronous>, transform_indices = @transform_1, window_bounds = array<i64: 16, 24>}, {pipeline_mode = #tpu.pipeline_mode<synchronous>, transform_indices = @transform_2, window_bounds = array<i64: 32, 16>}, {pipeline_mode = #tpu.pipeline_mode<synchronous>, transform_indices = @transform_3, window_bounds = array<i64: 1, 48>}, {pipeline_mode = #tpu.pipeline_mode<synchronous>, transform_indices = @transform_4, window_bounds = array<i64: 1, 48>}, {transform_indices = @transform_5, window_bounds = array<i64: 1, 16, 48>}]} {
    %c0 = arith.constant 0 : index
    %c0_0 = arith.constant 0 : index
    %c0_1 = arith.constant 0 : index
    %c0_2 = arith.constant 0 : index
    %0 = vector.load %arg1[%c0, %c0_0, %c0_1, %c0_2] : memref<1x3x24x32xi8, #tpu.memory_space<vmem>>, vector<1x3x24x32xi8>
    %1 = vector.shape_cast %0 : vector<1x3x24x32xi8> to vector<3x24x32xi8>
    %2 = arith.extui %1 : vector<3x24x32xi8> to vector<3x24x32xi32>
    %3 = arith.sitofp %2 : vector<3x24x32xi32> to vector<3x24x32xf32>
    %4 = vector.shape_cast %3 : vector<3x24x32xf32> to vector<72x32xf32>
    %c0_3 = arith.constant 0 : index
    %c0_4 = arith.constant 0 : index
    %5 = vector.load %arg3[%c0_3, %c0_4] : memref<32x16xf32, #tpu.memory_space<vmem>>, vector<32x16xf32>
    %cst = arith.constant dense<0.000000e+00> : vector<72x16xf32>
    %6 = tpu.matmul %4, %5, %cst {dimension_numbers = #tpu.dot_dimension_numbers<[1], [0], [0], [1], [0, 0, 1, 1], [], []>} : vector<72x32xf32>, vector<32x16xf32>, vector<72x16xf32> -> vector<72x16xf32>
    %c0_5 = arith.constant 0 : index
    %c0_6 = arith.constant 0 : index
    %7 = vector.load %arg2[%c0_5, %c0_6] : memref<16x24xf32, #tpu.memory_space<vmem>>, vector<16x24xf32>
    %8 = vector.extract_strided_slice %6 {offsets = [0, 0], sizes = [24, 16], strides = [1, 1]} : vector<72x16xf32> to vector<24x16xf32>
    %cst_7 = arith.constant dense<0.000000e+00> : vector<16x16xf32>
    %9 = tpu.matmul %7, %8, %cst_7 {dimension_numbers = #tpu.dot_dimension_numbers<[1], [0], [0], [1], [0, 0, 1, 1], [], []>} : vector<16x24xf32>, vector<24x16xf32>, vector<16x16xf32> -> vector<16x16xf32>
    %10 = vector.extract_strided_slice %6 {offsets = [24, 0], sizes = [24, 16], strides = [1, 1]} : vector<72x16xf32> to vector<24x16xf32>
    %cst_8 = arith.constant dense<0.000000e+00> : vector<16x16xf32>
    %11 = tpu.matmul %7, %10, %cst_8 {dimension_numbers = #tpu.dot_dimension_numbers<[1], [0], [0], [1], [0, 0, 1, 1], [], []>} : vector<16x24xf32>, vector<24x16xf32>, vector<16x16xf32> -> vector<16x16xf32>
    %12 = vector.extract_strided_slice %6 {offsets = [48, 0], sizes = [24, 16], strides = [1, 1]} : vector<72x16xf32> to vector<24x16xf32>
    %cst_9 = arith.constant dense<0.000000e+00> : vector<16x16xf32>
    %13 = tpu.matmul %7, %12, %cst_9 {dimension_numbers = #tpu.dot_dimension_numbers<[1], [0], [0], [1], [0, 0, 1, 1], [], []>} : vector<16x24xf32>, vector<24x16xf32>, vector<16x16xf32> -> vector<16x16xf32>
    %14 = tpu.concatenate %9, %11, %13 in 1 : vector<16x16xf32>, vector<16x16xf32>, vector<16x16xf32> -> vector<16x48xf32>
    %c0_10 = arith.constant 0 : index
    %c0_11 = arith.constant 0 : index
    %15 = vector.load %arg4[%c0_10, %c0_11] : memref<1x48xf32, #tpu.memory_space<vmem>>, vector<1x48xf32>
    %16 = vector.broadcast %15 : vector<1x48xf32> to vector<16x48xf32>
    %17 = arith.mulf %14, %16 : vector<16x48xf32>
    %c0_12 = arith.constant 0 : index
    %c0_13 = arith.constant 0 : index
    %18 = vector.load %arg5[%c0_12, %c0_13] : memref<1x48xf32, #tpu.memory_space<vmem>>, vector<1x48xf32>
    %19 = vector.broadcast %18 : vector<1x48xf32> to vector<16x48xf32>
    %20 = arith.addf %17, %19 : vector<16x48xf32>
    %c0_14 = arith.constant 0 : index
    %c0_15 = arith.constant 0 : index
    %c0_16 = arith.constant 0 : index
    %21 = vector.load %arg6[%c0_14, %c0_15, %c0_16] : memref<1x16x48xf32, #tpu.memory_space<vmem>>, vector<1x16x48xf32>
    %22 = vector.shape_cast %21 : vector<1x16x48xf32> to vector<16x48xf32>
    %23 = vector.shape_cast %20 : vector<16x48xf32> to vector<1x16x48xf32>
    tpu.vector_store %arg6[%c0_14, %c0_15, %c0_16], %23 {strides = array<i32>} : memref<1x16x48xf32, #tpu.memory_space<vmem>>, vector<1x16x48xf32>,
    return
  }
  func.func @transform_0(%arg0: i32) -> (i32, i32, i32, i32) {
    %c0_i32 = arith.constant 0 : i32
    %c0_i32_0 = arith.constant 0 : i32
    %c0_i32_1 = arith.constant 0 : i32
    %c0_i32_2 = arith.constant 0 : i32
    return %arg0, %c0_i32, %c0_i32_0, %c0_i32_1 : i32, i32, i32, i32
  }
  func.func @transform_1(%arg0: i32) -> (i32, i32) {
    %c0_i32 = arith.constant 0 : i32
    %c0_i32_0 = arith.constant 0 : i32
    %c0_i32_1 = arith.constant 0 : i32
    return %c0_i32, %c0_i32_0 : i32, i32
  }
  func.func @transform_2(%arg0: i32) -> (i32, i32) {
    %c0_i32 = arith.constant 0 : i32
    %c0_i32_0 = arith.constant 0 : i32
    %c0_i32_1 = arith.constant 0 : i32
    return %c0_i32, %c0_i32_0 : i32, i32
  }
  func.func @transform_3(%arg0: i32) -> (i32, i32) {
    %c0_i32 = arith.constant 0 : i32
    %c0_i32_0 = arith.constant 0 : i32
    %c0_i32_1 = arith.constant 0 : i32
    return %c0_i32, %c0_i32_0 : i32, i32
  }
  func.func @transform_4(%arg0: i32) -> (i32, i32) {
    %c0_i32 = arith.constant 0 : i32
    %c0_i32_0 = arith.constant 0 : i32
    %c0_i32_1 = arith.constant 0 : i32
    return %c0_i32, %c0_i32_0 : i32, i32
  }
  func.func @transform_5(%arg0: i32) -> (i32, i32, i32) {
    %c0_i32 = arith.constant 0 : i32
    %c0_i32_0 = arith.constant 0 : i32
    %c0_i32_1 = arith.constant 0 : i32
    return %arg0, %c0_i32, %c0_i32_0 : i32, i32, i32
  }
}

</mosaic_0001>

<bundles_post_ra>
// kernel: tpu_custom_call.1
= control target key start
LH: loop header
LB: loop body
LE: loop exit
PB: predicated region body
PF: predicated region fallthrough
CT: control target
= control target key end

     0   :  { %10 = vsyncpa [#allocation3], 0  ;;  %s1330_s0 = inlined_call_operand.vmem [shape: u8[2,3,24,32], index: 0, kind: input, shape index: {}]   ;;  %s1331_s1 = inlined_call_operand.hbm [shape: f32[16,24], index: 1, kind: input, shape index: {}]   ;;  %s1332_s2 = inlined_call_operand.vmem [shape: f32[32,16], index: 2, kind: input, shape index: {}]   ;;  %s1333_s3 = inlined_call_operand.vmem [shape: f32[1,48], index: 3, kind: input, shape index: {}]   ;;  %s1334_s4 = inlined_call_operand.vmem [shape: f32[1,48], index: 4, kind: input, shape index: {}]   ;;  %s1335_s5 = inlined_call_operand.hbm [shape: f32[2,16,48], index: 5, kind: output, shape index: {}]  }
   0x1   :  { %11 = vsyncpa [#allocation4], 0 }
   0x2   :  { %13 = vsyncpa [#allocation4 + $0x1], 0  ;;  %s1139_s18 = smov 0   ;;  %s1141_s19 = smov 0  }
   0x3   :  { %s1143_s20 = smov 0   ;;  %s1145_s21 = smov 0  }
   0x4 LB: > { %s1160_s22 = sadd.s32 4294967295, %s1096_s21   ;;  %s780_s23 = sadd.s32 4294967294, %s1096_s21   ;;  %s1096_s21 = sphi %s1145_s21, %s1351_s21   ;;  %s1092_s20 = sphi %s1143_s20, %s1350_s20   ;;  %s1088_s19 = sphi %s1141_s19, %s1349_s19   ;;  %s1084_s18 = sphi %s1139_s18, %s1348_s18  }
   0x5   : > { %s1164_s24 = sadd.s32 1, %s1096_s21   ;;  %s136_s25 = sadd.s32 1, %s1092_s20 }
   0x6   : > { %s133_s26 = ssub.s32 %s1096_s21, %s1164_s24  ;;  %p146_p0 = scmp.ne.s32.totalorder %s1092_s20, %s1088_s19 }
   0x7   : > { %p134_p1 = scmp.eq.s32.totalorder %s133_s26, 0  ;;  %p147_p2 = scmp.eq.s32.totalorder %s1160_s22, 1 }
   0x8   : > { %p152_p3 = scmp.ne.s32.totalorder %s1088_s19, %s1084_s18  ;;  %p153_p4 = scmp.eq.s32.totalorder %s780_s23, 1 }
   0x9   : > { %s1175_s27 = scalar_select %p134_p1, %s1092_s20, %s136_s25  }
   0xa   : > { %p1177_p5 = por %p147_p2, %p146_p0  ;;  %p1181_p6 = por %p153_p4, %p152_p3 }
   0xb   : > { %p781_p7 = scmp.ge.s32.totalorder %s1096_s21, 1  ;;  %p160_p8 = scmp.lt.s32.totalorder %s1096_s21, 3 }
   0xc   : > { %s1339_s28 = scalar_select %p1177_p5, 1, 0 }
   0xd   : > { %s1340_s29 = scalar_select %p1181_p6, 1, 0 }
   0xe   : > { %p1336_p9 = scmp.eq.s32.totalorder %s1160_s22, 0  ;;  %p1188_p10 = pnand %p781_p7, %p160_p8 }
   0xf   : > { %s1098_s6 = smov [#allocation2]   ;;  %s1002_s11 = scalar_lea.hbm %s1331_s1, 256 }
  0x10   : > { %s1341_s30 = scalar_select %p1188_p10, 1, 0 }
  0x11   : > { %s172_s7 = sshll.u32 %s1098_s6, 4  ;;  %p949_p11 = pneg %p1188_p10  ;;  %s173_s7 = int_to_ptr.vmem [resolvable:$true] %s172_s7 }
  0x12   : > { %p1003_p13 = scmp.ne.s32.totalorder %s1331_s1, %s1002_s11  ;;  %p1009_p3 = scmp.lt.u32.totalorder %s1002_s11, %s1331_s1 }
  0x13   : > { %p1196_p12 = pnand %p1336_p9, %p949_p11 }
  0x15   : > { %p1004_p0 = pneg %p1196_p12 }
  0x17   : > { %p1005_p1 = pnand %p1004_p0, %p1003_p13 }
  0x19   : > { %p1006_p2 = pneg %p1005_p1 }
  0x1b   : > { %p1011_p4 = pnand %p1009_p3, %p1006_p2 }
  0x1d   : > { %1014 = shalt.err (!%p1011_p4)
}
  0x1e   : > { %s1015_s16 = scalar_lea.vmem %s173_s7, 256  ;;  %p1023_p9 = scmp.lt.s32.totalorder %s173_s7, %s173_s7 }
  0x1f   : > { %p1016_p7 = scmp.ne.s32.totalorder %s173_s7, %s1015_s16  ;;  %p1024_p6 = scmp.lt.s32.totalorder %s1015_s16, %s1015_s16 }
  0x21   : > { %p1018_p8 = pnand %p1016_p7, %p1004_p0  ;;  %p1025_p5 = por %p1024_p6, %p1023_p9 }
  0x23   : > { %p1019_p11 = pneg %p1018_p8 }
  0x25   : > { %p1026_p10 = pnand %p1025_p5, %p1019_p11 }
  0x27   : > { %1029 = shalt.err (!%p1026_p10)
}
  0x28   : > { %s1099_s17 = smov 128   ;;  %s1100_s23 = smov 8  }
  0x29   : > { %952 = dma.hbm_to_vmem [thread:$0]  (!%p1196_p12), %s1331_s1, 256, %s173_s7, [#allocation3], %s1099_s17, %s1099_s17, %s1100_s23  }
  0x2a   : > { %p1343_p13 = scmp.ne.s32.totalorder %s1341_s30, 0 }
  0x2b   : > { %p1344_p1 = scmp.eq.s32.totalorder (!%p1343_p13), %s1160_s22, 0 }
  0x2c   : > { %205 = sbr.rel (%p1343_p13) target bundleno = 662 (0x296), region = 40 }
  0x33   : > { %1075 = dma.done.wait (%p1344_p1), [#allocation3], 256   ;;  %p1345_p0 = pmov %p1344_p1 }
  0x34   : > { %p233_p5 = scmp.lt.s32.totalorder %s1160_s22, 1  ;;  %v1101_v0 = vmov 0.0|0.0   ;;  %vm1102_vm0 = vmmov 0   ;;  %v1103_v1 = vmov 0.0   ;;  %v274_v2 = vld [vmem:[%s1332_s2] sm:$0xff]  ;;  %v275_v3 = vld [vmem:[%s1332_s2 + $0x8] sm:$0xff] }
  0x35   : > { %1077 = vsyncadd (%p1345_p0), [#allocation3], 4294967040  ;;  %917 = vmatprep.subr.bf16.mxu0 %v1101_v0  ;;  %863 = vmatprep.mubr.msk.f32.mxu0 %vm1102_vm0, %v1103_v1  ;;  %v276_v4 = vld [vmem:[%s1332_s2 + $0x10] sm:$0xff]  ;;  %v918_v5 = vpack.c.bf16 %v275_v3, %v274_v2  ;;  %v277_v6 = vld [vmem:[%s1332_s2 + $0x18] sm:$0xff]  ;;  %vm278_vm1 = vcmask 261120   ;;  %vm418_vm2 = vcmask 195584  }
  0x36   : > { %s234_s6 = scalar_select %p233_p5, %s1160_s22, 1  ;;  %935 = vmatprep.subr.bf16.mxu1 %v1101_v0  ;;  %884 = vmatprep.mubr.msk.f32.mxu1 %vm1102_vm0, %v1103_v1  ;;  %v921_v11 = vpack.c.bf16 %v277_v6, %v276_v4  ;;  %v416_v38 = vld [vmem:[#allocation2] sm:$0xff]  ;;  %v417_v50 = vld [vmem:[#allocation2 + $0x8] sm:$0xff]  ;;  %vm666_vm3 = vcmask 130048   ;;  %vm689_vm4 = vcmask 392192  }
  0x37   : > { %919 = vmatpush3.bf16.msra.mxu0 %v918_v5  ;;  %937 = vmatpush3.bf16.msra.mxu1 %v918_v5  ;;  %s1104_s23 = smov 16   ;;  %s1105_s25 = smov 32   ;;  %v803_v4 = vld [vmem:[%s1333_s3] ss:$0 sm:$0xff] }
  0x38   : > { %s942_s30 = smul.u32 18, %s234_s6  ;;  %920 = vmatprep.subr.bf16.mxu0 %v1101_v0  ;;  %936 = vmatprep.subr.bf16.mxu1 %v1101_v0  ;;  %s230_s26 = sand.u32 1, %s1088_s19  }
  0x39   : > { %s786_s7 = sshll.u32 %s230_s26, 4  ;;  %s810_s10 = sshll.u32 %s1160_s22, 8 }
  0x3a   : > { %s237_s9 = scalar_lea.vmem %s1330_s0, %s942_s30  ;;  %s232_s11 = scalar_lea.vmem [#allocation5], %s786_s7 }
  0x3b   : > { %v812_v7 = vld [vmem:[%s237_s9] sm:$0xff]   ;;  %v940_v10 = vld [vmem:[%s237_s9 + $0x8] sm:$0xff]   ;;  %v246_v15 = vld [vmem:[%s237_s9 + $0x10] sm:$0x3]  ;;  %922 = vmatpush3.bf16.msra.mxu0 %v921_v11  ;;  %938 = vmatpush3.bf16.msra.mxu1 %v921_v11  ;;  %s706_s12 = sshll.u32 %s232_s11, 4  ;;  %s1285_s15 = scalar_lea.hbm %s1335_s5, %s810_s10  ;;  %s1287_s12 = int_to_ptr.vmem [resolvable:$true] %s706_s12 }
  0x3c   : > { %v813_v8 = vunpack.c.0.s8 %v812_v7  ;;  %v814_v9 = vunpack.c.1.s8 %v812_v7  ;;  %v826_v12 = vunpack.c.3.s8 %v940_v10  ;;  %v817_v18 = vunpack.c.2.s8 %v812_v7  ;;  %s1289_s16 = scalar_lea.sflag [#allocation4], %s230_s26  ;;  %s1030_s22 = scalar_lea.vmem %s1287_s12, 256 }
  0x3d   : > { %v255_v20 = vunpack.c.0.s8 %v246_v15  ;;  %v818_v23 = vunpack.c.3.s8 %v812_v7  ;;  %v821_v28 = vunpack.c.0.s8 %v940_v10  ;;  %v822_v31 = vunpack.c.1.s8 %v940_v10  ;;  %p1031_p6 = scmp.ne.s32.totalorder %s1287_s12, %s1030_s22  ;;  %p1346_p9 = scmp.ne.s32.totalorder %s1339_s28, 0 }
  0x3e   : > { %v256_v13 = vand.u32 255, %v813_v8  ;;  %v263_v14 = vand.u32 255, %v826_v12  ;;  %v257_v17 = vand.u32 255, %v814_v9  ;;  %v258_v22 = vand.u32 255, %v817_v18  ;;  %v804_v8 = vld [vmem:[%s1334_s4] ss:$0 sm:$0xff] }
  0x3f   : > { %v264_v24 = vand.u32 255, %v255_v20  ;;  %v259_v27 = vand.u32 255, %v818_v23  ;;  %v260_v30 = vand.u32 255, %v821_v28  ;;  %v261_v33 = vand.u32 255, %v822_v31  ;;  %p1032_p10 = pnand %p1031_p6, %p1346_p9  ;;  %s1106_s17 = smov [#allocation5]  }
  0x40   : > { %v265_v16 = vcvt.s32.f32 %v256_v13  ;;  %v272_v19 = vcvt.s32.f32 %v263_v14  ;;  %v266_v21 = vcvt.s32.f32 %v257_v17  ;;  %v267_v26 = vcvt.s32.f32 %v258_v22 }
  0x41   : > { %v273_v25 = vcvt.s32.f32 %v264_v24  ;;  %v268_v29 = vcvt.s32.f32 %v259_v27  ;;  %v269_v32 = vcvt.s32.f32 %v260_v30  ;;  %v825_v34 = vunpack.c.2.s8 %v940_v10  ;;  %p1033_p12 = pneg %p1032_p10 }
  0x42   : > { %864 = vmatmul.mubr.msk.f32.vlgmr.msra.gmra.mrb[0].mxu0 %vm278_vm1, %v265_v16  ;;  %885 = vmatmul.mubr.msk.f32.vlgmr.msra.gmra.mrb[0].mxu1 %vm278_vm1, %v272_v19  ;;  %v270_v35 = vcvt.s32.f32 %v261_v33 }
  0x43   : > { %866 = vmatprep.mubr.msk.f32.mxu0 %vm1102_vm0, %v1103_v1  ;;  %887 = vmatprep.mubr.msk.f32.mxu1 %vm1102_vm0, %v1103_v1  ;;  %v262_v36 = vand.u32 255, %v825_v34 }
  0x45   : > { %v271_v37 = vcvt.s32.f32 %v262_v36 }
  0x46   : > { %867 = vmatmul.mubr.msk.f32.gmra.mrb[2].mxu0 %vm278_vm1, %v266_v21  ;;  %888 = vmatmul.mubr.msk.f32.gmra.mrb[2].mxu1 %vm278_vm1, %v273_v25 }
  0x47   : > { %869 = vmatprep.mubr.msk.f32.mxu0 %vm1102_vm0, %v1103_v1  ;;  %896 = vmatprep.mubr.msk.f32.mxu1 %vm418_vm2, %v416_v38 }
  0x4a   : > { %870 = vmatmul.mubr.msk.f32.gmra.mrb[4].mxu0 %vm278_vm1, %v267_v26 }
  0x4b   : > { %872 = vmatprep.mubr.msk.f32.mxu0 %vm1102_vm0, %v1103_v1 }
  0x4e   : > { %873 = vmatmul.mubr.msk.f32.gmra.mrb[6].mxu0 %vm278_vm1, %v268_v29 }
  0x4f   : > { %875 = vmatprep.mubr.msk.f32.mxu0 %vm1102_vm0, %v1103_v1 }
  0x52   : > { %876 = vmatmul.mubr.msk.f32.gmra.mrb[8].mxu0 %vm278_vm1, %v269_v32 }
  0x53   : > { %878 = vmatprep.mubr.msk.f32.mxu0 %vm1102_vm0, %v1103_v1 }
  0x56   : > { %879 = vmatmul.mubr.msk.f32.gmra.mrb[10].mxu0 %vm278_vm1, %v270_v35 }
  0x57   : > { %881 = vmatprep.mubr.msk.f32.mxu0 %vm1102_vm0, %v1103_v1 }
  0x5a   : > { %882 = vmatmul.mubr.msk.f32.gmra.mrb[12].mxu0 %vm278_vm1, %v271_v37 }
 0x115   : > { %v372_v39 = vpop.f32.mrb[0].mxu0  ;;  %v407_v40 = vpop.f32.mrb[0].mxu1 }
 0x116   : > { %v865_v41 = vpop.f32.mrb[1].mxu0  ;;  %v886_v42 = vpop.f32.mrb[1].mxu1 }
 0x119   : > { %v377_v43 = vpop.f32.mrb[2].mxu0  ;;  %v412_v44 = vpop.f32.mrb[2].mxu1 }
 0x11a   : > { %v923_v45 = vpack.c.bf16 %v377_v43, %v372_v39  ;;  %v868_v46 = vpop.f32.mrb[3].mxu0  ;;  %v889_v47 = vpop.f32.mrb[3].mxu1 }
 0x11c   : > { %924 = vmatprep.subr.bf16.mxu1 %v923_v45 }
 0x11d   : > { %v382_v48 = vpop.f32.mrb[4].mxu0  ;;  %926 = vmatpush3.bf16.msra.mxu1 %v923_v45 }
 0x11e   : > { %v871_v49 = vpop.f32.mrb[5].mxu0  ;;  %894 = vmatprep.subr.mxu1 %v382_v48 }
 0x121   : > { %v387_v51 = vpop.f32.mrb[6].mxu0  ;;  %895 = vmatpush3.msra.mxu1 %v382_v48 }
 0x122   : > { %v874_v52 = vpop.f32.mrb[7].mxu0  ;;  %897 = vmatmul.mubr.msk.f32.vlgmr.msra.gmra.mrb[4].mxu1 %vm418_vm2, %v417_v50 }
 0x123   : > { %905 = vmatprep.mubr.msk.f32.mxu1 %vm418_vm2, %v416_v38 }
 0x125   : > { %v392_v53 = vpop.f32.mrb[8].mxu0 }
 0x126   : > { %v927_v54 = vpack.c.bf16 %v392_v53, %v387_v51  ;;  %v877_v55 = vpop.f32.mrb[9].mxu0 }
 0x128   : > { %928 = vmatprep.subr.bf16.mxu1 %v927_v54 }
 0x129   : > { %v397_v56 = vpop.f32.mrb[10].mxu0  ;;  %930 = vmatpush3.bf16.msra.mxu1 %v927_v54 }
 0x12a   : > { %v880_v57 = vpop.f32.mrb[11].mxu0  ;;  %903 = vmatprep.subr.mxu1 %v397_v56 }
 0x12d   : > { %v402_v58 = vpop.f32.mrb[12].mxu0  ;;  %904 = vmatpush3.msra.mxu1 %v397_v56 }
 0x12e   : > { %v931_v59 = vpack.c.bf16 %v407_v40, %v402_v58  ;;  %v883_v60 = vpop.f32.mrb[13].mxu0  ;;  %906 = vmatmul.mubr.msk.f32.vlgmr.msra.gmra.mrb[6].mxu1 %vm418_vm2, %v417_v50 }
 0x12f   : > { %914 = vmatprep.mubr.msk.f32.mxu1 %vm418_vm2, %v416_v38 }
 0x130   : > { %932 = vmatprep.subr.bf16.mxu1 %v931_v59 }
 0x131   : > { %934 = vmatpush3.bf16.msra.mxu1 %v931_v59 }
 0x132   : > { %912 = vmatprep.subr.mxu1 %v412_v44 }
 0x135   : > { %913 = vmatpush3.msra.mxu1 %v412_v44 }
 0x136   : > { %915 = vmatmul.mubr.msk.f32.vlgmr.msra.gmra.mrb[8].mxu1 %vm418_vm2, %v417_v50 }
 0x1f5   : > { %v898_v61 = vpop.f32.mrb[4].mxu1 }
 0x1f6   : > { %v491_v62 = vpop.f32.mrb[5].mxu1 }
 0x201   : > { %v907_v63 = vpop.f32.mrb[6].mxu1 }
 0x202   : > { %v566_v0 = vpop.f32.mrb[7].mxu1 }
 0x203   : > { %652 = vrot.lane.b32.xlu0 %v566_v0, %s1104_s23 }
 0x207   : > { %654 = vrot.lane.b32.xlu0 %v907_v63, %s1104_s23  ;;  %s1034_s23 = sshll.u32 %s1106_s17, 4  ;;  %s1035_s23 = int_to_ptr.vmem [resolvable:$false] %s1034_s23 }
 0x208   : > { %p1037_p2 = scmp.lt.s32.totalorder %s1287_s12, %s1035_s23 }
 0x209   : > { %v916_v1 = vpop.f32.mrb[8].mxu1 }
 0x20a   : > { %v641_v2 = vpop.f32.mrb[9].mxu1 }
 0x20b   : > { %660 = vrot.lane.b32.xlu1 %v641_v2, %s1105_s25 }
 0x20f   : > { %662 = vrot.lane.b32.xlu1 %v916_v1, %s1105_s25  ;;  %s1036_s25 = scalar_lea.vmem %s1035_s23, 512 }
 0x210   : > { %p1038_p3 = scmp.lt.s32.totalorder %s1036_s25, %s1030_s22 }
 0x212   : > { %p1039_p4 = por %p1038_p3, %p1037_p2 }
 0x214   : > { %p1040_p7 = pnand %p1039_p4, %p1033_p12 }
 0x275   : > { %v653_v3 = vpop.permute.xlu0 %652 }
 0x276   : > { %v667_v5 = vsel %vm666_vm3, %v491_v62, %v653_v3 }
 0x279   : > { %v655_v7 = vpop.permute.xlu0 %654 }
 0x27a   : > { %v668_v11 = vsel %vm666_vm3, %v898_v61, %v655_v7 }
 0x27d   : > { %v661_v6 = vpop.permute.xlu1 %660 }
 0x27e   : > { %v669_v9 = vsel %vm278_vm1, %v667_v5, %v661_v6 }
 0x27f   : > { %v678_v10 = vmul.f32 %v803_v4, %v669_v9 }
 0x281   : > { %v687_v12 = vadd.f32 %v804_v8, %v678_v10  ;;  %v663_v13 = vpop.permute.xlu1 %662 }
 0x282   : > { %v670_v14 = vsel %vm278_vm1, %v668_v11, %v663_v13 }
 0x283   : > { %690 = vst.msk [vmem:[%s232_s11] sm:$0xff] %vm689_vm4, %v687_v12  ;;  %v679_v15 = vmul.f32 %v803_v4, %v670_v14 }
 0x285   : > { %v688_v16 = vadd.f32 %v804_v8, %v679_v15 }
 0x287   : > { %691 = vst.msk [vmem:[%s232_s11 + $0x8] sm:$0xff] %vm689_vm4, %v688_v16 }
 0x288   : > { %1043 = shalt.err (!%p1040_p7)
}
 0x289   : > { %s1044_s26 = scalar_lea.hbm %s1285_s15, 256  ;;  %s1048_s7 = scalar_lea.hbm %s1335_s5, 512 }
 0x28a   : > { %p1045_p8 = scmp.ne.s32.totalorder %s1285_s15, %s1044_s26  ;;  %p1049_p1 = scmp.lt.u32.totalorder %s1285_s15, %s1335_s5 }
 0x28b   : > { %p1050_p0 = scmp.lt.u32.totalorder %s1048_s7, %s1044_s26  ;;  %p1052_p6 = scmp.lt.u32.totalorder %s1044_s26, %s1285_s15 }
 0x28c   : > { %p1046_p11 = pnand %p1045_p8, %p1346_p9 }
 0x28d   : > { %p1051_p5 = por %p1050_p0, %p1049_p1 }
 0x28e   : > { %p1047_p13 = pneg %p1046_p11 }
 0x28f   : > { %p1053_p10 = por %p1052_p6, %p1051_p5 }
 0x291   : > { %p1054_p12 = pnand %p1053_p10, %p1047_p13 }
 0x293   : > { %1057 = shalt.err (!%p1054_p12)
}
 0x294   : > { %s1107_s10 = smov 128   ;;  %s1108_s11 = smov 8  }
 0x295   : > { %947 = dma.vmem_to_hbm [thread:$0]  (%p1346_p9), %s1287_s12, 256, %s1285_s15, %s1289_s16, %s1107_s10, %s1107_s10, %s1108_s11  }
 0x296 PF: > { %p959_p2 = scmp.ge.s32.totalorder %s1096_s21, 2  ;;  %s721_s13 = sand.u32 1, %s1084_s18  }
 0x297   : > { %p1347_p3 = scmp.ne.s32.totalorder %s1340_s29, 0  ;;  %s722_s14 = scalar_lea.sflag [#allocation4], %s721_s13 }
 0x299   : > { %p954_p4 = pnand %p959_p2, %p1347_p3 }
 0x29b   : > { %1079 = dma.done.wait (!%p954_p4), %s722_s14, 256  }
 0x29c   : > { %1081 = vsyncadd (!%p954_p4), %s722_s14, 4294967040  ;;  %p16_p7 = scmp.ge.s32.totalorder %s1164_s24, 4   ;;  %s1348_s18 = smov %s1088_s19 }
 0x29d   : > { %s1349_s19 = smov %s1092_s20  ;;  %s1350_s20 = smov %s1175_s27 }
 0x29e   : > { %s1351_s21 = smov %s1164_s24  ;;  %18 = sbr.rel (!%p16_p7) target bundleno = 4 (0x4), region = 80 }
 0x2a5   :  { %727 = vsyncpa [#allocation3], 1 }
 0x2a6   :  { %729 = vsyncpa [#allocation3 + $0x1], 1 }
 0x2a7   :  { %730 = vsyncpa [#allocation4], 1 }
 0x2a8   :  { %732 = vsyncpa [#allocation4 + $0x1], 1 }

</bundles_post_ra>
